<compile_context>
chip_gen: v5e
topology: v5e:2x2
jax: 0.10.0
libtpu: 0.0.40
codegen_flags: <defaults>
</compile_context>

<pallas_src>
import math

import jax
import jax.numpy as jnp
from jax.experimental import pallas as pl
from jax.experimental.pallas import tpu as pltpu


def _make_combination_kernel(num_ops):
    """Kernel: out = sum_k w[k] * x_k  (weights already include the *K factor)."""

    def kernel(w_ref, *refs):
        x_refs = refs[:num_ops]          # K tiled VMEM inputs
        o_ref = refs[num_ops]            # tiled VMEM output
        acc = w_ref[0] * x_refs[0][...].astype(jnp.float32)
        for k in range(1, num_ops):      # static unroll, K is tiny
            acc = acc + w_ref[k] * x_refs[k][...].astype(jnp.float32)
        o_ref[...] = acc.astype(o_ref.dtype)

    return kernel


def _choose_lane(total):
    """Largest lane width (multiple of 128) that tiles `total` with 8-row groups."""
    for lane in (2048, 1024, 512, 256, 128):
        if total % lane == 0 and (total // lane) % 8 == 0:
            return lane
    return 512  # fall back to zero-padding the flat slab


def ops_combination(op_outputs, alphas):
    """Pallas implementation of Ops_Combination.forward's weighted combination.

    op_outputs: list of K arrays, each (N, C, H, W) — the pre-computed op_k(input).
    alphas:     (K,) architecture logits.
    Returns K * sum_k softmax(alphas)[k] * op_outputs[k], same shape as each input.
    """
    num_ops = len(op_outputs)
    shape = op_outputs[0].shape
    dtype = op_outputs[0].dtype
    itemsize = jnp.dtype(dtype).itemsize
    total = math.prod(shape)

    # Hoisted K-way softmax (scalar work, done once — not per tile).
    weights = (float(num_ops)
               * jax.nn.softmax(alphas.astype(jnp.float32), axis=-1)).astype(jnp.float32)

    # Lane-dense flat layout + row tiling.
    lane = _choose_lane(total)
    rows = -(-total // lane)

    # ~2 MiB tiles, but keep 2*(K+1) double-buffered streams under a
    # conservative cross-generation VMEM budget (v7x has only 64 MiB/TC).
    budget_bytes = 40 * 1024 * 1024
    tile_bytes_cap = min(2 * 1024 * 1024, budget_bytes // (2 * (num_ops + 1)))
    tile_rows = max(8, (tile_bytes_cap // (lane * itemsize)) // 8 * 8)
    tile_rows = min(tile_rows, ((rows + 7) // 8) * 8)

    n_tiles = -(-rows // tile_rows)
    rows_padded = n_tiles * tile_rows
    padded_total = rows_padded * lane

    def to_slab(x):
        flat = x.reshape(-1)
        if padded_total != total:
            flat = jnp.pad(flat, (0, padded_total - total))
        return flat.reshape(rows_padded, lane)

    slabs = [to_slab(x) for x in op_outputs]

    kernel = _make_combination_kernel(num_ops)
    tile_bytes = tile_rows * lane * itemsize
    vmem_limit = int(min(max(2 * (num_ops + 1) * tile_bytes + (2 << 20), 8 << 20), 48 << 20))

    out2d = pl.pallas_call(
        kernel,
        out_shape=jax.ShapeDtypeStruct((rows_padded, lane), dtype),
        grid=(n_tiles,),
        in_specs=[pl.BlockSpec(memory_space=pltpu.MemorySpace.SMEM)]  # weights (K,)
        + [pl.BlockSpec((tile_rows, lane), lambda i: (i, 0)) for _ in range(num_ops)],
        out_specs=pl.BlockSpec((tile_rows, lane), lambda i: (i, 0)),
        compiler_params=pltpu.CompilerParams(
            dimension_semantics=("parallel",),   # v7x: shard row tiles over both TCs
            vmem_limit_bytes=vmem_limit,
        ),
        cost_estimate=pl.CostEstimate(
            flops=2 * num_ops * total,
            transcendentals=0,
            bytes_accessed=(num_ops + 1) * total * itemsize,
        ),
    )(weights, *slabs)

    if padded_total != total:
        return out2d.reshape(-1)[:total].reshape(shape)
    return out2d.reshape(shape)


def _reference(op_outputs, alphas):
    a = jax.nn.softmax(alphas, axis=-1)
    out = sum(a[k] * op_outputs[k] for k in range(len(op_outputs)))
    return len(op_outputs) * out


if __name__ == "__main__":
    key = jax.random.PRNGKey(0)
    N, C, H, W = 2, 4, 16, 16
    K = 3
    keys = jax.random.split(key, K + 1)

    # Stand-ins for the K candidate-operator outputs op_k(input).
    # TODO(synk): the OPS dict (convs / pools / BatchNorm2d with learned state) is
    # external to this module; those forward passes are not re-implemented here.
    op_outputs = [jax.random.normal(keys[k], (N, C, H, W), dtype=jnp.float32)
                  for k in range(K)]
    alphas = jax.random.normal(keys[K], (K,), dtype=jnp.float32)

    out = ops_combination(op_outputs, alphas)
    out = jax.block_until_ready(out)

    ref = _reference(op_outputs, alphas)
    assert out.shape == (N, C, H, W)
    assert jnp.allclose(out, ref, atol=1e-5, rtol=1e-5), "mismatch vs reference"

    print("KERNEL_OK")
</pallas_src>

<mosaic_0001>
module attributes {stable_mosaic.version = 11 : i64} {
  func.func @kernel(%arg0: i32, %arg1: memref<3xf32, #tpu.memory_space<smem>>, %arg2: memref<8x256xf32, #tpu.memory_space<vmem>>, %arg3: memref<8x256xf32, #tpu.memory_space<vmem>>, %arg4: memref<8x256xf32, #tpu.memory_space<vmem>>, %arg5: memref<8x256xf32, #tpu.memory_space<vmem>>) attributes {dimension_semantics = [#tpu.dimension_semantics<parallel>], iteration_bounds = array<i64: 1>, scalar_prefetch = 0 : i64, scratch_operands = 0 : i64, tpu.core_type = #tpu.core_type<tc>, window_params = [{transform_indices = @transform_0, window_bounds = array<i64: 3>}, {transform_indices = @transform_1, window_bounds = array<i64: 8, 256>}, {transform_indices = @transform_2, window_bounds = array<i64: 8, 256>}, {transform_indices = @transform_3, window_bounds = array<i64: 8, 256>}, {transform_indices = @transform_4, window_bounds = array<i64: 8, 256>}]} {
    %c0 = arith.constant 0 : index
    %0 = memref.load %arg1[%c0] : memref<3xf32, #tpu.memory_space<smem>>
    %c0_0 = arith.constant 0 : index
    %c0_1 = arith.constant 0 : index
    %1 = vector.load %arg2[%c0_0, %c0_1] : memref<8x256xf32, #tpu.memory_space<vmem>>, vector<8x256xf32>
    %2 = vector.broadcast %0 : f32 to vector<8x256xf32>
    %3 = arith.mulf %2, %1 : vector<8x256xf32>
    %c1 = arith.constant 1 : index
    %4 = memref.load %arg1[%c1] : memref<3xf32, #tpu.memory_space<smem>>
    %c0_2 = arith.constant 0 : index
    %c0_3 = arith.constant 0 : index
    %5 = vector.load %arg3[%c0_2, %c0_3] : memref<8x256xf32, #tpu.memory_space<vmem>>, vector<8x256xf32>
    %6 = vector.broadcast %4 : f32 to vector<8x256xf32>
    %7 = arith.mulf %6, %5 : vector<8x256xf32>
    %8 = arith.addf %3, %7 : vector<8x256xf32>
    %c2 = arith.constant 2 : index
    %9 = memref.load %arg1[%c2] : memref<3xf32, #tpu.memory_space<smem>>
    %c0_4 = arith.constant 0 : index
    %c0_5 = arith.constant 0 : index
    %10 = vector.load %arg4[%c0_4, %c0_5] : memref<8x256xf32, #tpu.memory_space<vmem>>, vector<8x256xf32>
    %11 = vector.broadcast %9 : f32 to vector<8x256xf32>
    %12 = arith.mulf %11, %10 : vector<8x256xf32>
    %13 = arith.addf %8, %12 : vector<8x256xf32>
    %c0_6 = arith.constant 0 : index
    %c0_7 = arith.constant 0 : index
    %14 = vector.load %arg5[%c0_6, %c0_7] : memref<8x256xf32, #tpu.memory_space<vmem>>, vector<8x256xf32>
    tpu.vector_store %arg5[%c0_6, %c0_7], %13 {strides = array<i32>} : memref<8x256xf32, #tpu.memory_space<vmem>>, vector<8x256xf32>,
    return
  }
  func.func @transform_0(%arg0: i32) -> i32 {
    %c0_i32 = arith.constant 0 : i32
    %c0_i32_0 = arith.constant 0 : i32
    return %c0_i32 : i32
  }
  func.func @transform_1(%arg0: i32) -> (i32, i32) {
    %c0_i32 = arith.constant 0 : i32
    %c0_i32_0 = arith.constant 0 : i32
    return %arg0, %c0_i32 : i32, i32
  }
  func.func @transform_2(%arg0: i32) -> (i32, i32) {
    %c0_i32 = arith.constant 0 : i32
    %c0_i32_0 = arith.constant 0 : i32
    return %arg0, %c0_i32 : i32, i32
  }
  func.func @transform_3(%arg0: i32) -> (i32, i32) {
    %c0_i32 = arith.constant 0 : i32
    %c0_i32_0 = arith.constant 0 : i32
    return %arg0, %c0_i32 : i32, i32
  }
  func.func @transform_4(%arg0: i32) -> (i32, i32) {
    %c0_i32 = arith.constant 0 : i32
    %c0_i32_0 = arith.constant 0 : i32
    return %arg0, %c0_i32 : i32, i32
  }
}

</mosaic_0001>

<bundles_post_ra>
// kernel: tpu_custom_call.1
= control target key start
LH: loop header
LB: loop body
LE: loop exit
PB: predicated region body
PF: predicated region fallthrough
CT: control target
= control target key end

     0   :  { %9 = vsyncpa [#allocation5], 0  ;;  %s283_s0 = inlined_call_operand.hbm [shape: f32[3], index: 0, kind: input, shape index: {}]   ;;  %s284_s1 = inlined_call_operand.hbm [shape: f32[8,256], index: 1, kind: input, shape index: {}]   ;;  %s285_s2 = inlined_call_operand.hbm [shape: f32[8,256], index: 2, kind: input, shape index: {}]   ;;  %s286_s3 = inlined_call_operand.hbm [shape: f32[8,256], index: 3, kind: input, shape index: {}]   ;;  %s287_s4 = inlined_call_operand.hbm [shape: f32[8,256], index: 4, kind: output, shape index: {}]  }
   0x1   :  { %10 = vsyncpa [#allocation3], 0 }
   0x2   :  { %11 = vsyncpa [#allocation8], 0  ;;  %s38_s17 = sshll.u32 %s285_s2, 4  ;;  %s39_s17 = int_to_ptr.hbm [resolvable:$true] %s38_s17 }
   0x3   :  { %12 = vsyncpa [#allocation4], 0  ;;  %s238_s18 = smov [#allocation7]   ;;  %s18_s22 = sshll.u32 %s283_s0, 4  ;;  %s19_s22 = int_to_ptr.hbm [resolvable:$true] %s18_s22 }
   0x4   :  { %s40_s19 = sshll.u32 %s238_s18, 4  ;;  %s239_s23 = smov [#allocation2]   ;;  %s41_s19 = int_to_ptr.vmem [resolvable:$true] %s40_s19 }
   0x5   :  { %43 = dma.hbm_to_vmem [thread:$0]  %s39_s17, 256, %s41_s19, [#allocation8]  }
   0x6   :  { %21 = dma.hbm_to_smem %s19_s22, 16, %s239_s23, [#allocation5]  }
   0x7   :  { %s27_s26 = sshll.u32 %s284_s1, 4  ;;  %s240_s27 = smov [#allocation6]   ;;  %s28_s26 = int_to_ptr.hbm [resolvable:$true] %s27_s26 }
   0x8   :  { %s29_s2 = sshll.u32 %s240_s27, 4  ;;  %s49_s30 = sshll.u32 %s286_s3, 4  ;;  %s30_s2 = int_to_ptr.vmem [resolvable:$true] %s29_s2  ;;  %s50_s30 = int_to_ptr.hbm [resolvable:$true] %s49_s30 }
   0x9   :  { %32 = dma.hbm_to_vmem [thread:$0]  %s28_s26, 256, %s30_s2, [#allocation3]  }
   0xa   :  { %s241_s5 = smov [#allocation9]  }
   0xb   :  { %s51_s0 = sshll.u32 %s241_s5, 4  ;;  %s52_s0 = int_to_ptr.vmem [resolvable:$true] %s51_s0 }
   0xc   :  { %54 = dma.hbm_to_vmem [thread:$0]  %s50_s30, 256, %s52_s0, [#allocation8]  }
   0xd   :  { %230 = dma.done.wait [#allocation5], 16  }
   0xe   :  { %231 = vsyncadd [#allocation5], 4294967280 }
   0xf   :  { %232 = dma.done.wait [#allocation3], 256  }
  0x10   :  { %233 = vsyncadd [#allocation3], 4294967040 }
  0x11   :  { %234 = dma.done.wait [#allocation8], 512  }
  0x12   :  { %235 = vsyncadd [#allocation8], 4294966784 }
  0x13   :  { %71 = sfence }
  0x14   :  { %s72_s1 = sld [smem:[#allocation2]]  ;;  %v73_v0 = vld [vmem:[#allocation6] sm:$0xff]  ;;  %v74_v1 = vld [vmem:[#allocation6 + $0x8] sm:$0xff]  ;;  %v79_v2 = vld [vmem:[#allocation7] sm:$0xff]  ;;  %s242_s3 = smov [#allocation10]  }
  0x15   :  { %s115_s6 = sld [smem:[#allocation2 + $0x1]]  ;;  %v80_v3 = vld [vmem:[#allocation7 + $0x8] sm:$0xff]  ;;  %v87_v5 = vld [vmem:[#allocation9] sm:$0xff]  ;;  %v88_v6 = vld [vmem:[#allocation9 + $0x8] sm:$0xff]  ;;  %s101_s8 = sshll.u32 %s242_s3, 4  ;;  %s102_s8 = int_to_ptr.vmem [resolvable:$true] %s101_s8 }
  0x16   :  { %s116_s7 = sld [smem:[#allocation2 + $0x2]]  ;;  %s103_s11 = sshll.u32 %s287_s4, 4  ;;  %s104_s11 = int_to_ptr.hbm [resolvable:$true] %s103_s11 }
  0x1a   :  { %v75_v4 = vstv %s72_s1 }
  0x1b   :  { %v76_v7 = vmul.f32 %v75_v4, %v73_v0  ;;  %v81_v8 = vstv %s115_s6  ;;  %v77_v9 = vmul.f32 %v75_v4, %v74_v1 }
  0x1c   :  { %v82_v10 = vmul.f32 %v81_v8, %v79_v2  ;;  %v89_v11 = vstv %s116_s7  ;;  %v83_v12 = vmul.f32 %v81_v8, %v80_v3 }
  0x1d   :  { %v90_v13 = vmul.f32 %v89_v11, %v87_v5  ;;  %v91_v14 = vmul.f32 %v89_v11, %v88_v6 }
  0x1e   :  { %v84_v15 = vadd.f32 %v82_v10, %v76_v7  ;;  %v85_v16 = vadd.f32 %v83_v12, %v77_v9 }
  0x20   :  { %v92_v17 = vadd.f32 %v90_v13, %v84_v15  ;;  %v93_v18 = vadd.f32 %v91_v14, %v85_v16 }
  0x22   :  { %94 = vst [vmem:[#allocation10] sm:$0xff] %v92_v17 }
  0x23   :  { %95 = vst [vmem:[#allocation10 + $0x8] sm:$0xff] %v93_v18 }
  0x24   :  { %106 = dma.vmem_to_hbm [thread:$0]  %s102_s8, 256, %s104_s11, [#allocation4]  }
  0x25   :  { %236 = dma.done.wait [#allocation4], 256  }
  0x26   :  { %237 = vsyncadd [#allocation4], 4294967040 }
  0x27   :  { %111 = vsyncpa [#allocation3], 1 }
  0x28   :  { %112 = vsyncpa [#allocation8], 1 }
  0x29   :  { %113 = vsyncpa [#allocation4], 1 }
  0x2a   :  { %114 = vsyncpa [#allocation5], 1 }

</bundles_post_ra>
